<compile_context>
chip_gen: v7x
topology: tpu7x:2x2x1
jax: 0.10.0
libtpu: 0.0.40
codegen_flags: <defaults>
</compile_context>

<pallas_src>
import functools

import jax
import jax.numpy as jnp
from jax import lax
from jax.experimental import pallas as pl
from jax.experimental.pallas import tpu as pltpu

LN_EPS = 1e-5


def _layer_norm(h, gamma, beta):
    mu = jnp.mean(h, axis=-1, keepdims=True)
    var = jnp.mean((h - mu) ** 2, axis=-1, keepdims=True)
    return (h - mu) * lax.rsqrt(var + LN_EPS) * gamma + beta


def sab_kernel(x_ref,
               wq_ref, bq_ref, wk_ref, bk_ref, wv_ref, bv_ref, wo_ref, bo_ref,
               g1_ref, b1_ref, wff_ref, bff_ref, g2_ref, b2_ref,
               out_ref):
    Bt, N, D = x_ref.shape

    # Read the per-feature vectors exactly once (no repeated broadcasts).
    bq = bq_ref[0]
    bk = bk_ref[0]
    bv = bv_ref[0]
    bo = bo_ref[0]
    g1 = g1_ref[0]
    b1 = b1_ref[0]
    bff = bff_ref[0]
    g2 = g2_ref[0]
    b2 = b2_ref[0]

    # Fold the batch block into the matmul M dimension: one big (Bt*N, D)
    # operand instead of Bt tiny (N, D) matmuls.
    x2 = x_ref[...].reshape(Bt * N, D)

    q = jnp.dot(x2, wq_ref[...], preferred_element_type=jnp.float32) + bq
    k = jnp.dot(x2, wk_ref[...], preferred_element_type=jnp.float32) + bk
    v = jnp.dot(x2, wv_ref[...], preferred_element_type=jnp.float32) + bv

    qb = q.reshape(Bt, N, D)
    kb = k.reshape(Bt, N, D)
    vb = v.reshape(Bt, N, D)

    # multiplicative compatibility: e = Q K^T (unscaled). Batched dot_general
    # contracting the last dims -- no explicit transpose of K.
    e = lax.dot_general(qb, kb, (((2,), (2,)), ((0,), (0,))),
                        preferred_element_type=jnp.float32)        # (Bt, N, N)

    # softmax over last dim; normalize with approx EUP reciprocal * p.
    e = e - jnp.max(e, axis=-1, keepdims=True)
    p = jnp.exp(e)
    inv = pl.reciprocal(jnp.sum(p, axis=-1, keepdims=True), approx=True)
    a = p * inv

    # context = A @ V, batched.
    o = lax.dot_general(a, vb, (((2,), (1,)), ((0,), (0,))),
                        preferred_element_type=jnp.float32)        # (Bt, N, D)
    o2 = o.reshape(Bt * N, D)
    attn = jnp.dot(o2, wo_ref[...], preferred_element_type=jnp.float32) + bo

    # MAB residual + LayerNorm 1
    h = _layer_norm(x2 + attn, g1, b1)

    # rFF + residual + LayerNorm 2
    ff = jnp.dot(h, wff_ref[...], preferred_element_type=jnp.float32) + bff
    out = _layer_norm(h + ff, g2, b2)

    out_ref[...] = out.reshape(Bt, N, D).astype(out_ref.dtype)


def _choose_batch_tile(B, max_bt=8):
    """Largest Bt <= max_bt dividing B that still leaves >= 2 grid steps
    (so a v7x megacore can shard the parallel batch axis)."""
    min_steps = 2 if B >= 2 else 1
    for bt in range(min(max_bt, B), 0, -1):
        if B % bt == 0 and B // bt >= min_steps:
            return bt
    return 1


@jax.jit
def sab_forward(x, params):
    B, N, D = x.shape
    Bt = _choose_batch_tile(B)

    x_spec = pl.BlockSpec((Bt, N, D), lambda b: (b, 0, 0))
    w_spec = pl.BlockSpec((D, D), lambda b: (0, 0))
    v_spec = pl.BlockSpec((1, D), lambda b: (0, 0))

    (wq, bq), (wk, bk), (wv, bv), (wo, bo) = params["linears"]
    g1, b1 = params["ln1"]
    wff, bff = params["rff"]
    g2, b2 = params["ln2"]

    flat_params = [wq, bq, wk, bk, wv, bv, wo, bo,
                   g1, b1, wff, bff, g2, b2]
    in_specs = ([x_spec]
                + [w_spec, v_spec] * 4      # fc_q, fc_k, fc_v, fc_o
                + [v_spec, v_spec]          # ln1 gamma/beta
                + [w_spec, v_spec]          # rFF
                + [v_spec, v_spec])         # ln2 gamma/beta

    # Advisory cost for XLA's scheduler.
    matmul_flops = 2 * B * N * D * D * 5
    attn_flops = 2 * B * N * N * D * 2
    cost = pl.CostEstimate(
        flops=matmul_flops + attn_flops,
        transcendentals=B * N * N + 3 * B * N,
        bytes_accessed=(2 * B * N * D + 5 * D * D + 9 * D) * 4,
    )

    return pl.pallas_call(
        sab_kernel,
        out_shape=jax.ShapeDtypeStruct((B, N, D), x.dtype),
        grid_spec=pltpu.PrefetchScalarGridSpec(
            num_scalar_prefetch=0,
            grid=(B // Bt,),
            in_specs=in_specs,
            out_specs=x_spec,
        ),
        compiler_params=pltpu.CompilerParams(
            dimension_semantics=("parallel",),
            vmem_limit_bytes=48 * 1024 * 1024,
        ),
        cost_estimate=cost,
    )(x, *flat_params)


def init_params(key, D):
    ks = jax.random.split(key, 5)

    def lin(k):
        kw, kb = jax.random.split(k)
        w = jax.random.normal(kw, (D, D), jnp.float32) * (1.0 / jnp.sqrt(D))
        b = jax.random.normal(kb, (1, D), jnp.float32) * 0.02
        return w, b

    wq, bq = lin(ks[0])
    wk, bk = lin(ks[1])
    wv, bv = lin(ks[2])
    wo, bo = lin(ks[3])
    wff, bff = lin(ks[4])
    g1 = jnp.ones((1, D), jnp.float32)
    b1 = jnp.zeros((1, D), jnp.float32)
    g2 = jnp.ones((1, D), jnp.float32)
    b2 = jnp.zeros((1, D), jnp.float32)
    return {
        "linears": [(wq, bq), (wk, bk), (wv, bv), (wo, bo)],
        "ln1": (g1, b1),
        "rff": (wff, bff),
        "ln2": (g2, b2),
    }


def sab_reference(x, params):
    (wq, bq), (wk, bk), (wv, bv), (wo, bo) = params["linears"]
    g1, b1 = params["ln1"]
    wff, bff = params["rff"]
    g2, b2 = params["ln2"]
    q = x @ wq + bq
    k = x @ wk + bk
    v = x @ wv + bv
    e = jnp.einsum("bmd,bnd->bmn", q, k)
    a = jax.nn.softmax(e, axis=-1)
    o = jnp.einsum("bmn,bnd->bmd", a, v)
    attn = o @ wo + bo
    h = _layer_norm(x + attn, g1, b1)
    ff = h @ wff + bff
    return _layer_norm(h + ff, g2, b2)


if __name__ == "__main__":
    key = jax.random.PRNGKey(0)
    kx, kp = jax.random.split(key)
    B, N, D = 2, 8, 32
    x = jax.random.normal(kx, (B, N, D), jnp.float32)
    params = init_params(kp, D)

    out = sab_forward(x, params)
    out = jax.block_until_ready(out)

    ref = sab_reference(x, params)
    assert out.shape == (B, N, D)
    # Tolerance relaxed vs. the exact-divide version because the softmax
    # denominator now uses the hardware approximate EUP reciprocal.
    assert jnp.allclose(out, ref, atol=1e-2, rtol=1e-2), "mismatch vs reference"
    print("KERNEL_OK")
</pallas_src>

<mosaic_0001>
module attributes {stable_mosaic.version = 11 : i64} {
  func.func @sab_kernel(%arg0: i32, %arg1: memref<1x8x32xf32, #tpu.memory_space<vmem>>, %arg2: memref<32x32xf32, #tpu.memory_space<vmem>>, %arg3: memref<1x32xf32, #tpu.memory_space<vmem>>, %arg4: memref<32x32xf32, #tpu.memory_space<vmem>>, %arg5: memref<1x32xf32, #tpu.memory_space<vmem>>, %arg6: memref<32x32xf32, #tpu.memory_space<vmem>>, %arg7: memref<1x32xf32, #tpu.memory_space<vmem>>, %arg8: memref<32x32xf32, #tpu.memory_space<vmem>>, %arg9: memref<1x32xf32, #tpu.memory_space<vmem>>, %arg10: memref<1x32xf32, #tpu.memory_space<vmem>>, %arg11: memref<1x32xf32, #tpu.memory_space<vmem>>, %arg12: memref<32x32xf32, #tpu.memory_space<vmem>>, %arg13: memref<1x32xf32, #tpu.memory_space<vmem>>, %arg14: memref<1x32xf32, #tpu.memory_space<vmem>>, %arg15: memref<1x32xf32, #tpu.memory_space<vmem>>, %arg16: memref<1x8x32xf32, #tpu.memory_space<vmem>>) attributes {dimension_semantics = [#tpu.dimension_semantics<parallel>], iteration_bounds = array<i64: 2>, scalar_prefetch = 0 : i64, scratch_operands = 0 : i64, tpu.core_type = #tpu.core_type<tc>, window_params = [{transform_indices = @transform_0, window_bounds = array<i64: 1, 8, 32>}, {pipeline_mode = #tpu.pipeline_mode<synchronous>, transform_indices = @transform_1, window_bounds = array<i64: 32, 32>}, {pipeline_mode = #tpu.pipeline_mode<synchronous>, transform_indices = @transform_2, window_bounds = array<i64: 1, 32>}, {pipeline_mode = #tpu.pipeline_mode<synchronous>, transform_indices = @transform_3, window_bounds = array<i64: 32, 32>}, {pipeline_mode = #tpu.pipeline_mode<synchronous>, transform_indices = @transform_4, window_bounds = array<i64: 1, 32>}, {pipeline_mode = #tpu.pipeline_mode<synchronous>, transform_indices = @transform_5, window_bounds = array<i64: 32, 32>}, {pipeline_mode = #tpu.pipeline_mode<synchronous>, transform_indices = @transform_6, window_bounds = array<i64: 1, 32>}, {pipeline_mode = #tpu.pipeline_mode<synchronous>, transform_indices = @transform_7, window_bounds = array<i64: 32, 32>}, {pipeline_mode = #tpu.pipeline_mode<synchronous>, transform_indices = @transform_8, window_bounds = array<i64: 1, 32>}, {pipeline_mode = #tpu.pipeline_mode<synchronous>, transform_indices = @transform_9, window_bounds = array<i64: 1, 32>}, {pipeline_mode = #tpu.pipeline_mode<synchronous>, transform_indices = @transform_10, window_bounds = array<i64: 1, 32>}, {pipeline_mode = #tpu.pipeline_mode<synchronous>, transform_indices = @transform_11, window_bounds = array<i64: 32, 32>}, {pipeline_mode = #tpu.pipeline_mode<synchronous>, transform_indices = @transform_12, window_bounds = array<i64: 1, 32>}, {pipeline_mode = #tpu.pipeline_mode<synchronous>, transform_indices = @transform_13, window_bounds = array<i64: 1, 32>}, {pipeline_mode = #tpu.pipeline_mode<synchronous>, transform_indices = @transform_14, window_bounds = array<i64: 1, 32>}, {transform_indices = @transform_15, window_bounds = array<i64: 1, 8, 32>}]} {
    %c0 = arith.constant 0 : index
    %c0_0 = arith.constant 0 : index
    %0 = vector.load %arg3[%c0, %c0_0] : memref<1x32xf32, #tpu.memory_space<vmem>>, vector<1x32xf32>
    %1 = vector.shape_cast %0 : vector<1x32xf32> to vector<32xf32>
    %c0_1 = arith.constant 0 : index
    %c0_2 = arith.constant 0 : index
    %2 = vector.load %arg5[%c0_1, %c0_2] : memref<1x32xf32, #tpu.memory_space<vmem>>, vector<1x32xf32>
    %3 = vector.shape_cast %2 : vector<1x32xf32> to vector<32xf32>
    %c0_3 = arith.constant 0 : index
    %c0_4 = arith.constant 0 : index
    %4 = vector.load %arg7[%c0_3, %c0_4] : memref<1x32xf32, #tpu.memory_space<vmem>>, vector<1x32xf32>
    %5 = vector.shape_cast %4 : vector<1x32xf32> to vector<32xf32>
    %c0_5 = arith.constant 0 : index
    %c0_6 = arith.constant 0 : index
    %6 = vector.load %arg9[%c0_5, %c0_6] : memref<1x32xf32, #tpu.memory_space<vmem>>, vector<1x32xf32>
    %7 = vector.shape_cast %6 : vector<1x32xf32> to vector<32xf32>
    %c0_7 = arith.constant 0 : index
    %c0_8 = arith.constant 0 : index
    %8 = vector.load %arg10[%c0_7, %c0_8] : memref<1x32xf32, #tpu.memory_space<vmem>>, vector<1x32xf32>
    %9 = vector.shape_cast %8 : vector<1x32xf32> to vector<32xf32>
    %c0_9 = arith.constant 0 : index
    %c0_10 = arith.constant 0 : index
    %10 = vector.load %arg11[%c0_9, %c0_10] : memref<1x32xf32, #tpu.memory_space<vmem>>, vector<1x32xf32>
    %11 = vector.shape_cast %10 : vector<1x32xf32> to vector<32xf32>
    %c0_11 = arith.constant 0 : index
    %c0_12 = arith.constant 0 : index
    %12 = vector.load %arg13[%c0_11, %c0_12] : memref<1x32xf32, #tpu.memory_space<vmem>>, vector<1x32xf32>
    %13 = vector.shape_cast %12 : vector<1x32xf32> to vector<32xf32>
    %c0_13 = arith.constant 0 : index
    %c0_14 = arith.constant 0 : index
    %14 = vector.load %arg14[%c0_13, %c0_14] : memref<1x32xf32, #tpu.memory_space<vmem>>, vector<1x32xf32>
    %15 = vector.shape_cast %14 : vector<1x32xf32> to vector<32xf32>
    %c0_15 = arith.constant 0 : index
    %c0_16 = arith.constant 0 : index
    %16 = vector.load %arg15[%c0_15, %c0_16] : memref<1x32xf32, #tpu.memory_space<vmem>>, vector<1x32xf32>
    %17 = vector.shape_cast %16 : vector<1x32xf32> to vector<32xf32>
    %c0_17 = arith.constant 0 : index
    %c0_18 = arith.constant 0 : index
    %c0_19 = arith.constant 0 : index
    %18 = vector.load %arg1[%c0_17, %c0_18, %c0_19] : memref<1x8x32xf32, #tpu.memory_space<vmem>>, vector<1x8x32xf32>
    %19 = vector.shape_cast %18 : vector<1x8x32xf32> to vector<8x32xf32>
    %c0_20 = arith.constant 0 : index
    %c0_21 = arith.constant 0 : index
    %20 = vector.load %arg2[%c0_20, %c0_21] : memref<32x32xf32, #tpu.memory_space<vmem>>, vector<32x32xf32>
    %cst = arith.constant dense<0.000000e+00> : vector<8x32xf32>
    %21 = tpu.matmul %19, %20, %cst {dimension_numbers = #tpu.dot_dimension_numbers<[1], [0], [0], [1], [0, 0, 1, 1], [], []>} : vector<8x32xf32>, vector<32x32xf32>, vector<8x32xf32> -> vector<8x32xf32>
    %22 = vector.shape_cast %1 : vector<32xf32> to vector<1x32xf32>
    %23 = vector.broadcast %22 : vector<1x32xf32> to vector<8x32xf32>
    %24 = arith.addf %21, %23 : vector<8x32xf32>
    %c0_22 = arith.constant 0 : index
    %c0_23 = arith.constant 0 : index
    %25 = vector.load %arg4[%c0_22, %c0_23] : memref<32x32xf32, #tpu.memory_space<vmem>>, vector<32x32xf32>
    %cst_24 = arith.constant dense<0.000000e+00> : vector<8x32xf32>
    %26 = tpu.matmul %19, %25, %cst_24 {dimension_numbers = #tpu.dot_dimension_numbers<[1], [0], [0], [1], [0, 0, 1, 1], [], []>} : vector<8x32xf32>, vector<32x32xf32>, vector<8x32xf32> -> vector<8x32xf32>
    %27 = vector.shape_cast %3 : vector<32xf32> to vector<1x32xf32>
    %28 = vector.broadcast %27 : vector<1x32xf32> to vector<8x32xf32>
    %29 = arith.addf %26, %28 : vector<8x32xf32>
    %c0_25 = arith.constant 0 : index
    %c0_26 = arith.constant 0 : index
    %30 = vector.load %arg6[%c0_25, %c0_26] : memref<32x32xf32, #tpu.memory_space<vmem>>, vector<32x32xf32>
    %cst_27 = arith.constant dense<0.000000e+00> : vector<8x32xf32>
    %31 = tpu.matmul %19, %30, %cst_27 {dimension_numbers = #tpu.dot_dimension_numbers<[1], [0], [0], [1], [0, 0, 1, 1], [], []>} : vector<8x32xf32>, vector<32x32xf32>, vector<8x32xf32> -> vector<8x32xf32>
    %32 = vector.shape_cast %5 : vector<32xf32> to vector<1x32xf32>
    %33 = vector.broadcast %32 : vector<1x32xf32> to vector<8x32xf32>
    %34 = arith.addf %31, %33 : vector<8x32xf32>
    %35 = vector.shape_cast %24 : vector<8x32xf32> to vector<1x8x32xf32>
    %36 = vector.shape_cast %29 : vector<8x32xf32> to vector<1x8x32xf32>
    %37 = vector.shape_cast %34 : vector<8x32xf32> to vector<1x8x32xf32>
    %cst_28 = arith.constant dense<0.000000e+00> : vector<1x8x8xf32>
    %38 = tpu.matmul %35, %36, %cst_28 {dimension_numbers = #tpu.dot_dimension_numbers<[2], [2], [1], [1], [0, 0, 0, 1, 1, 1], [0], [0]>} : vector<1x8x32xf32>, vector<1x8x32xf32>, vector<1x8x8xf32> -> vector<1x8x8xf32>
    %cst_29 = arith.constant dense<0xFF800000> : vector<1x8xf32>
    %39 = vector.multi_reduction <maximumf>, %38, %cst_29 [2] : vector<1x8x8xf32> to vector<1x8xf32>
    %40 = vector.shape_cast %39 : vector<1x8xf32> to vector<1x8x1xf32>
    %41 = vector.broadcast %40 : vector<1x8x1xf32> to vector<1x8x8xf32>
    %42 = arith.subf %38, %41 : vector<1x8x8xf32>
    %43 = math.exp %42 : vector<1x8x8xf32>
    %cst_30 = arith.constant dense<0.000000e+00> : vector<1x8xf32>
    %44 = vector.multi_reduction <add>, %43, %cst_30 [2] : vector<1x8x8xf32> to vector<1x8xf32>
    %45 = vector.shape_cast %44 : vector<1x8xf32> to vector<1x8x1xf32>
    %46 = tpu.reciprocal %45 {approx = true} : vector<1x8x1xf32> -> vector<1x8x1xf32>
    %47 = vector.broadcast %46 : vector<1x8x1xf32> to vector<1x8x8xf32>
    %48 = arith.mulf %43, %47 : vector<1x8x8xf32>
    %cst_31 = arith.constant dense<0.000000e+00> : vector<1x8x32xf32>
    %49 = tpu.matmul %48, %37, %cst_31 {dimension_numbers = #tpu.dot_dimension_numbers<[2], [1], [1], [2], [0, 0, 0, 1, 1, 2], [0], [0]>} : vector<1x8x8xf32>, vector<1x8x32xf32>, vector<1x8x32xf32> -> vector<1x8x32xf32>
    %50 = vector.shape_cast %49 : vector<1x8x32xf32> to vector<8x32xf32>
    %c0_32 = arith.constant 0 : index
    %c0_33 = arith.constant 0 : index
    %51 = vector.load %arg8[%c0_32, %c0_33] : memref<32x32xf32, #tpu.memory_space<vmem>>, vector<32x32xf32>
    %cst_34 = arith.constant dense<0.000000e+00> : vector<8x32xf32>
    %52 = tpu.matmul %50, %51, %cst_34 {dimension_numbers = #tpu.dot_dimension_numbers<[1], [0], [0], [1], [0, 0, 1, 1], [], []>} : vector<8x32xf32>, vector<32x32xf32>, vector<8x32xf32> -> vector<8x32xf32>
    %53 = vector.shape_cast %7 : vector<32xf32> to vector<1x32xf32>
    %54 = vector.broadcast %53 : vector<1x32xf32> to vector<8x32xf32>
    %55 = arith.addf %52, %54 : vector<8x32xf32>
    %56 = arith.addf %19, %55 : vector<8x32xf32>
    %cst_35 = arith.constant dense<0.000000e+00> : vector<8xf32>
    %57 = vector.multi_reduction <add>, %56, %cst_35 [1] : vector<8x32xf32> to vector<8xf32>
    %58 = vector.shape_cast %57 : vector<8xf32> to vector<8x1xf32>
    %cst_36 = arith.constant 3.200000e+01 : f32
    %59 = vector.broadcast %cst_36 : f32 to vector<8x1xf32>
    %60 = arith.divf %58, %59 : vector<8x1xf32>
    %61 = vector.broadcast %60 : vector<8x1xf32> to vector<8x32xf32>
    %62 = arith.subf %56, %61 : vector<8x32xf32>
    %63 = arith.mulf %62, %62 : vector<8x32xf32>
    %cst_37 = arith.constant dense<0.000000e+00> : vector<8xf32>
    %64 = vector.multi_reduction <add>, %63, %cst_37 [1] : vector<8x32xf32> to vector<8xf32>
    %65 = vector.shape_cast %64 : vector<8xf32> to vector<8x1xf32>
    %cst_38 = arith.constant 3.200000e+01 : f32
    %66 = vector.broadcast %cst_38 : f32 to vector<8x1xf32>
    %67 = arith.divf %65, %66 : vector<8x1xf32>
    %68 = vector.broadcast %60 : vector<8x1xf32> to vector<8x32xf32>
    %69 = arith.subf %56, %68 : vector<8x32xf32>
    %cst_39 = arith.constant 9.99999974E-6 : f32
    %70 = vector.broadcast %cst_39 : f32 to vector<8x1xf32>
    %71 = arith.addf %67, %70 : vector<8x1xf32>
    %72 = math.rsqrt %71 : vector<8x1xf32>
    %73 = vector.broadcast %72 : vector<8x1xf32> to vector<8x32xf32>
    %74 = arith.mulf %69, %73 : vector<8x32xf32>
    %75 = vector.shape_cast %9 : vector<32xf32> to vector<1x32xf32>
    %76 = vector.broadcast %75 : vector<1x32xf32> to vector<8x32xf32>
    %77 = arith.mulf %74, %76 : vector<8x32xf32>
    %78 = vector.shape_cast %11 : vector<32xf32> to vector<1x32xf32>
    %79 = vector.broadcast %78 : vector<1x32xf32> to vector<8x32xf32>
    %80 = arith.addf %77, %79 : vector<8x32xf32>
    %c0_40 = arith.constant 0 : index
    %c0_41 = arith.constant 0 : index
    %81 = vector.load %arg12[%c0_40, %c0_41] : memref<32x32xf32, #tpu.memory_space<vmem>>, vector<32x32xf32>
    %cst_42 = arith.constant dense<0.000000e+00> : vector<8x32xf32>
    %82 = tpu.matmul %80, %81, %cst_42 {dimension_numbers = #tpu.dot_dimension_numbers<[1], [0], [0], [1], [0, 0, 1, 1], [], []>} : vector<8x32xf32>, vector<32x32xf32>, vector<8x32xf32> -> vector<8x32xf32>
    %83 = vector.shape_cast %13 : vector<32xf32> to vector<1x32xf32>
    %84 = vector.broadcast %83 : vector<1x32xf32> to vector<8x32xf32>
    %85 = arith.addf %82, %84 : vector<8x32xf32>
    %86 = arith.addf %80, %85 : vector<8x32xf32>
    %cst_43 = arith.constant dense<0.000000e+00> : vector<8xf32>
    %87 = vector.multi_reduction <add>, %86, %cst_43 [1] : vector<8x32xf32> to vector<8xf32>
    %88 = vector.shape_cast %87 : vector<8xf32> to vector<8x1xf32>
    %cst_44 = arith.constant 3.200000e+01 : f32
    %89 = vector.broadcast %cst_44 : f32 to vector<8x1xf32>
    %90 = arith.divf %88, %89 : vector<8x1xf32>
    %91 = vector.broadcast %90 : vector<8x1xf32> to vector<8x32xf32>
    %92 = arith.subf %86, %91 : vector<8x32xf32>
    %93 = arith.mulf %92, %92 : vector<8x32xf32>
    %cst_45 = arith.constant dense<0.000000e+00> : vector<8xf32>
    %94 = vector.multi_reduction <add>, %93, %cst_45 [1] : vector<8x32xf32> to vector<8xf32>
    %95 = vector.shape_cast %94 : vector<8xf32> to vector<8x1xf32>
    %cst_46 = arith.constant 3.200000e+01 : f32
    %96 = vector.broadcast %cst_46 : f32 to vector<8x1xf32>
    %97 = arith.divf %95, %96 : vector<8x1xf32>
    %98 = vector.broadcast %90 : vector<8x1xf32> to vector<8x32xf32>
    %99 = arith.subf %86, %98 : vector<8x32xf32>
    %cst_47 = arith.constant 9.99999974E-6 : f32
    %100 = vector.broadcast %cst_47 : f32 to vector<8x1xf32>
    %101 = arith.addf %97, %100 : vector<8x1xf32>
    %102 = math.rsqrt %101 : vector<8x1xf32>
    %103 = vector.broadcast %102 : vector<8x1xf32> to vector<8x32xf32>
    %104 = arith.mulf %99, %103 : vector<8x32xf32>
    %105 = vector.shape_cast %15 : vector<32xf32> to vector<1x32xf32>
    %106 = vector.broadcast %105 : vector<1x32xf32> to vector<8x32xf32>
    %107 = arith.mulf %104, %106 : vector<8x32xf32>
    %108 = vector.shape_cast %17 : vector<32xf32> to vector<1x32xf32>
    %109 = vector.broadcast %108 : vector<1x32xf32> to vector<8x32xf32>
    %110 = arith.addf %107, %109 : vector<8x32xf32>
    %111 = vector.shape_cast %110 : vector<8x32xf32> to vector<1x8x32xf32>
    %c0_48 = arith.constant 0 : index
    %c0_49 = arith.constant 0 : index
    %c0_50 = arith.constant 0 : index
    %112 = vector.load %arg16[%c0_48, %c0_49, %c0_50] : memref<1x8x32xf32, #tpu.memory_space<vmem>>, vector<1x8x32xf32>
    tpu.vector_store %arg16[%c0_48, %c0_49, %c0_50], %111 {strides = array<i32>} : memref<1x8x32xf32, #tpu.memory_space<vmem>>, vector<1x8x32xf32>,
    return
  }
  func.func @transform_0(%arg0: i32) -> (i32, i32, i32) {
    %c0_i32 = arith.constant 0 : i32
    %c0_i32_0 = arith.constant 0 : i32
    %c0_i32_1 = arith.constant 0 : i32
    return %arg0, %c0_i32, %c0_i32_0 : i32, i32, i32
  }
  func.func @transform_1(%arg0: i32) -> (i32, i32) {
    %c0_i32 = arith.constant 0 : i32
    %c0_i32_0 = arith.constant 0 : i32
    %c0_i32_1 = arith.constant 0 : i32
    return %c0_i32, %c0_i32_0 : i32, i32
  }
  func.func @transform_2(%arg0: i32) -> (i32, i32) {
    %c0_i32 = arith.constant 0 : i32
    %c0_i32_0 = arith.constant 0 : i32
    %c0_i32_1 = arith.constant 0 : i32
    return %c0_i32, %c0_i32_0 : i32, i32
  }
  func.func @transform_3(%arg0: i32) -> (i32, i32) {
    %c0_i32 = arith.constant 0 : i32
    %c0_i32_0 = arith.constant 0 : i32
    %c0_i32_1 = arith.constant 0 : i32
    return %c0_i32, %c0_i32_0 : i32, i32
  }
  func.func @transform_4(%arg0: i32) -> (i32, i32) {
    %c0_i32 = arith.constant 0 : i32
    %c0_i32_0 = arith.constant 0 : i32
    %c0_i32_1 = arith.constant 0 : i32
    return %c0_i32, %c0_i32_0 : i32, i32
  }
  func.func @transform_5(%arg0: i32) -> (i32, i32) {
    %c0_i32 = arith.constant 0 : i32
    %c0_i32_0 = arith.constant 0 : i32
    %c0_i32_1 = arith.constant 0 : i32
    return %c0_i32, %c0_i32_0 : i32, i32
  }
  func.func @transform_6(%arg0: i32) -> (i32, i32) {
    %c0_i32 = arith.constant 0 : i32
    %c0_i32_0 = arith.constant 0 : i32
    %c0_i32_1 = arith.constant 0 : i32
    return %c0_i32, %c0_i32_0 : i32, i32
  }
  func.func @transform_7(%arg0: i32) -> (i32, i32) {
    %c0_i32 = arith.constant 0 : i32
    %c0_i32_0 = arith.constant 0 : i32
    %c0_i32_1 = arith.constant 0 : i32
    return %c0_i32, %c0_i32_0 : i32, i32
  }
  func.func @transform_8(%arg0: i32) -> (i32, i32) {
    %c0_i32 = arith.constant 0 : i32
    %c0_i32_0 = arith.constant 0 : i32
    %c0_i32_1 = arith.constant 0 : i32
    return %c0_i32, %c0_i32_0 : i32, i32
  }
  func.func @transform_9(%arg0: i32) -> (i32, i32) {
    %c0_i32 = arith.constant 0 : i32
    %c0_i32_0 = arith.constant 0 : i32
    %c0_i32_1 = arith.constant 0 : i32
    return %c0_i32, %c0_i32_0 : i32, i32
  }
  func.func @transform_10(%arg0: i32) -> (i32, i32) {
    %c0_i32 = arith.constant 0 : i32
    %c0_i32_0 = arith.constant 0 : i32
    %c0_i32_1 = arith.constant 0 : i32
    return %c0_i32, %c0_i32_0 : i32, i32
  }
  func.func @transform_11(%arg0: i32) -> (i32, i32) {
    %c0_i32 = arith.constant 0 : i32
    %c0_i32_0 = arith.constant 0 : i32
    %c0_i32_1 = arith.constant 0 : i32
    return %c0_i32, %c0_i32_0 : i32, i32
  }
  func.func @transform_12(%arg0: i32) -> (i32, i32) {
    %c0_i32 = arith.constant 0 : i32
    %c0_i32_0 = arith.constant 0 : i32
    %c0_i32_1 = arith.constant 0 : i32
    return %c0_i32, %c0_i32_0 : i32, i32
  }
  func.func @transform_13(%arg0: i32) -> (i32, i32) {
    %c0_i32 = arith.constant 0 : i32
    %c0_i32_0 = arith.constant 0 : i32
    %c0_i32_1 = arith.constant 0 : i32
    return %c0_i32, %c0_i32_0 : i32, i32
  }
  func.func @transform_14(%arg0: i32) -> (i32, i32) {
    %c0_i32 = arith.constant 0 : i32
    %c0_i32_0 = arith.constant 0 : i32
    %c0_i32_1 = arith.constant 0 : i32
    return %c0_i32, %c0_i32_0 : i32, i32
  }
  func.func @transform_15(%arg0: i32) -> (i32, i32, i32) {
    %c0_i32 = arith.constant 0 : i32
    %c0_i32_0 = arith.constant 0 : i32
    %c0_i32_1 = arith.constant 0 : i32
    return %arg0, %c0_i32, %c0_i32_0 : i32, i32, i32
  }
}

</mosaic_0001>

<bundles_post_ra>
// kernel: sab_forward.1
= control target key start
LH: loop header
LB: loop body
LE: loop exit
PB: predicated region body
PF: predicated region fallthrough
CT: control target
= control target key end

     0   :  { %s2284_s0 = inlined_call_operand.hbm [shape: f32[2,8,32], index: 0, kind: input, shape index: {}]   ;;  %s2285_s1 = inlined_call_operand.hbm [shape: f32[32,32], index: 1, kind: input, shape index: {}]   ;;  %s2286_s2 = inlined_call_operand.vmem [shape: f32[1,32], index: 2, kind: input, shape index: {}]   ;;  %s2287_s3 = inlined_call_operand.hbm [shape: f32[32,32], index: 3, kind: input, shape index: {}]   ;;  %s2288_s4 = inlined_call_operand.vmem [shape: f32[1,32], index: 4, kind: input, shape index: {}]   ;;  %s2289_s5 = inlined_call_operand.hbm [shape: f32[32,32], index: 5, kind: input, shape index: {}]   ;;  %s2290_s6 = inlined_call_operand.vmem [shape: f32[1,32], index: 6, kind: input, shape index: {}]   ;;  %s2291_s7 = inlined_call_operand.hbm [shape: f32[32,32], index: 7, kind: input, shape index: {}]   ;;  %s2292_s8 = inlined_call_operand.vmem [shape: f32[1,32], index: 8, kind: input, shape index: {}]   ;;  %s2293_s9 = inlined_call_operand.vmem [shape: f32[1,32], index: 9, kind: input, shape index: {}]   ;;  %s2294_s10 = inlined_call_operand.vmem [shape: f32[1,32], index: 10, kind: input, shape index: {}]   ;;  %s2295_s11 = inlined_call_operand.vmem [shape: f32[32,32], index: 11, kind: input, shape index: {}]   ;;  %s2296_s12 = inlined_call_operand.vmem [shape: f32[1,32], index: 12, kind: input, shape index: {}]   ;;  %s2297_s13 = inlined_call_operand.vmem [shape: f32[1,32], index: 13, kind: input, shape index: {}]   ;;  %s2298_s14 = inlined_call_operand.vmem [shape: f32[1,32], index: 14, kind: input, shape index: {}]   ;;  %s2299_s15 = inlined_call_operand.hbm [shape: f32[2,8,32], index: 15, kind: output, shape index: {}]  }
   0x1   :  { %2305 = sst [smem:[#allocation16_spill]] %s2284_s0 }
   0x2   :  { %2306 = sst [smem:[#allocation17_spill]] %s2285_s1 }
   0x3   :  { %2307 = sst [smem:[#allocation18_spill]] %s2286_s2 }
   0x4   :  { %2308 = sst [smem:[#allocation19_spill]] %s2293_s9 }
   0x5   :  { %2309 = sst [smem:[#allocation20_spill]] %s2294_s10 }
   0x6   :  { %2310 = sst [smem:[#allocation21_spill]] %s2295_s11 }
   0x7   :  { %2311 = sst [smem:[#allocation22_spill]] %s2296_s12 }
   0x8   :  { %2312 = sst [smem:[#allocation23_spill]] %s2297_s13 }
   0x9   :  { %2313 = sst [smem:[#allocation24_spill]] %s2298_s14 }
   0xa   :  { %2314 = sst [smem:[#allocation25_spill]] %s2299_s15 }
   0xb   :  { %20 = vsyncpa [#allocation3], 0 }
   0xc   :  { %22 = vsyncpa [#allocation3 + $0x1], 0 }
   0xd   :  { %23 = vsyncpa [#allocation6], 0 }
   0xe   :  { %24 = vsyncpa [#allocation9], 0 }
   0xf   :  { %25 = vsyncpa [#allocation4], 0 }
  0x10   :  { %27 = vsyncpa [#allocation4 + $0x1], 0  ;;  %s1899_s18 = smov 0   ;;  %s1901_s19 = smov 0  }
  0x11   :  { %s1903_s20 = smov 0   ;;  %s1905_s21 = smov 0  }
  0x12 LB: > { %s1808_s22 = smov [#allocation5]   ;;  %s1920_s24 = sadd.s32 4294967295, %s1806_s21   ;;  %s1806_s21 = sphi %s1905_s21, %s2345_s21   ;;  %s1802_s20 = sphi %s1903_s20, %s2344_s20   ;;  %s1798_s19 = sphi %s1901_s19, %s2343_s19   ;;  %s1794_s18 = sphi %s1899_s18, %s2342_s18  }
  0x13   : > { %s396_s23 = sshll.u32 %s1808_s22, 4  ;;  %p1330_p0 = scmp.ge.s32.totalorder %s1806_s21, 1  ;;  %s1925_s23 = int_to_ptr.vmem [resolvable:$true] %s396_s23 }
  0x14   : > { %p2302_p1 = scmp.eq.s32.totalorder %s1920_s24, 0  ;;  %p384_p2 = scmp.lt.s32.totalorder %s1806_s21, 3 }
  0x15   : > { %s1809_s26 = smov [#allocation8]   ;;  %s1810_s29 = smov [#allocation7]  }
  0x16   : > { %p1927_p3 = pnand %p1330_p0, %p384_p2  ;;  %s428_s27 = sshll.u32 %s1809_s26, 4  ;;  %s1940_s27 = int_to_ptr.vmem [resolvable:$true] %s428_s27 }
  0x17   : > { %s412_s30 = sshll.u32 %s1810_s29, 4  ;;  %s2317_s1 = sld [smem:[#allocation17_spill]]  ;;  %s1942_s30 = int_to_ptr.vmem [resolvable:$true] %s412_s30 }
  0x18   : > { %s2315_s25 = scalar_select %p1927_p3, 1, 0 }
  0x19   : > { %p1510_p5 = pneg %p1927_p3 }
  0x1b   : > { %p1936_p6 = pnand %p1510_p5, %p2302_p1 }
  0x1d   : > { %s1590_s22 = scalar_lea.hbm %s2317_s1, 512  ;;  %p1952_p8 = pneg %p1936_p6 }
  0x1e   : > { %p1591_p7 = scmp.ne.s32.totalorder %s2317_s1, %s1590_s22  ;;  %p1597_p11 = scmp.lt.u32.totalorder %s1590_s22, %s2317_s1 }
  0x20   : > { %p1593_p9 = pnand %p1952_p8, %p1591_p7 }
  0x22   : > { %p1594_p10 = pneg %p1593_p9 }
  0x24   : > { %p1599_p12 = pnand %p1597_p11, %p1594_p10 }
  0x26   : > { %1602 = shalt.err (!%p1599_p12)
}
  0x27   : > { %s1603_s14 = scalar_lea.vmem %s1925_s23, 512  ;;  %p1611_p5 = scmp.lt.s32.totalorder %s1925_s23, %s1925_s23 }
  0x28   : > { %p1604_p13 = scmp.ne.s32.totalorder %s1925_s23, %s1603_s14  ;;  %p1612_p4 = scmp.lt.s32.totalorder %s1603_s14, %s1603_s14 }
  0x2a   : > { %p1606_p0 = pnand %p1604_p13, %p1952_p8  ;;  %p1613_p7 = por %p1612_p4, %p1611_p5 }
  0x2c   : > { %p1607_p2 = pneg %p1606_p0 }
  0x2e   : > { %p1614_p9 = pnand %p1613_p7, %p1607_p2 }
  0x30   : > { %1617 = shalt.err (!%p1614_p9)
}
  0x31   : > { %s1811_s15 = smov 128   ;;  %s1812_s13 = smov 8  }
  0x32   : > { %1513 = dma.hbm_to_vmem [thread:$0]  (!%p1936_p6), %s2317_s1, 512, %s1925_s23, [#allocation6], %s1811_s15, %s1811_s15, %s1812_s13  }
  0x33   : > { %s1618_s14 = scalar_lea.hbm %s2289_s5, 512 }
  0x34   : > { %p1619_p4 = scmp.ne.s32.totalorder %s2289_s5, %s1618_s14  ;;  %p1625_p12 = scmp.lt.u32.totalorder %s1618_s14, %s2289_s5 }
  0x36   : > { %p1621_p10 = pnand %p1619_p4, %p1952_p8 }
  0x38   : > { %p1622_p11 = pneg %p1621_p10 }
  0x3a   : > { %p1627_p13 = pnand %p1625_p12, %p1622_p11 }
  0x3c   : > { %1630 = shalt.err (!%p1627_p13)
}
  0x3d   : > { %s1631_s23 = scalar_lea.vmem %s1940_s27, 512  ;;  %p1639_p7 = scmp.lt.s32.totalorder %s1940_s27, %s1940_s27 }
  0x3e   : > { %p1632_p0 = scmp.ne.s32.totalorder %s1940_s27, %s1631_s23  ;;  %p1640_p9 = scmp.lt.s32.totalorder %s1631_s23, %s1631_s23 }
  0x40   : > { %p1634_p2 = pnand %p1632_p0, %p1952_p8  ;;  %p1641_p4 = por %p1640_p9, %p1639_p7 }
  0x42   : > { %p1635_p5 = pneg %p1634_p2 }
  0x44   : > { %p1642_p10 = pnand %p1641_p4, %p1635_p5 }
  0x46   : > { %1645 = shalt.err (!%p1642_p10)
}
  0x47   : > { %1519 = dma.hbm_to_vmem [thread:$0]  (!%p1936_p6), %s2289_s5, 512, %s1940_s27, [#allocation9], %s1811_s15, %s1811_s15, %s1812_s13  }
  0x48   : > { %s1646_s16 = scalar_lea.hbm %s2287_s3, 512 }
  0x49   : > { %p1647_p11 = scmp.ne.s32.totalorder %s2287_s3, %s1646_s16  ;;  %p1653_p0 = scmp.lt.u32.totalorder %s1646_s16, %s2287_s3 }
  0x4b   : > { %p1649_p12 = pnand %p1647_p11, %p1952_p8 }
  0x4d   : > { %p1650_p13 = pneg %p1649_p12 }
  0x4f   : > { %p1655_p2 = pnand %p1653_p0, %p1650_p13 }
  0x51   : > { %1658 = shalt.err (!%p1655_p2)
}
  0x52   : > { %s1659_s27 = scalar_lea.vmem %s1942_s30, 512  ;;  %p1667_p4 = scmp.lt.s32.totalorder %s1942_s30, %s1942_s30 }
  0x53   : > { %p1660_p5 = scmp.ne.s32.totalorder %s1942_s30, %s1659_s27  ;;  %p1668_p10 = scmp.lt.s32.totalorder %s1659_s27, %s1659_s27 }
  0x55   : > { %p1662_p7 = pnand %p1660_p5, %p1952_p8  ;;  %p1669_p11 = por %p1668_p10, %p1667_p4 }
  0x57   : > { %p1663_p9 = pneg %p1662_p7 }
  0x59   : > { %p1670_p12 = pnand %p1669_p11, %p1663_p9 }
  0x5b   : > { %1673 = shalt.err (!%p1670_p12)
}
  0x5c   : > { %1516 = dma.hbm_to_vmem [thread:$0]  (!%p1936_p6), %s2287_s3, 512, %s1942_s30, [#allocation6], %s1811_s15, %s1811_s15, %s1812_s13  }
  0x5d   : > { %s1813_s10 = smov [#allocation10]   ;;  %s1674_s17 = scalar_lea.hbm %s2291_s7, 512 }
  0x5e   : > { %s444_s11 = sshll.u32 %s1813_s10, 4  ;;  %p1675_p13 = scmp.ne.s32.totalorder %s2291_s7, %s1674_s17  ;;  %s445_s11 = int_to_ptr.vmem [resolvable:$true] %s444_s11 }
  0x5f   : > { %p1681_p5 = scmp.lt.u32.totalorder %s1674_s17, %s2291_s7 }
  0x60   : > { %p1677_p0 = pnand %p1675_p13, %p1952_p8 }
  0x62   : > { %p1678_p2 = pneg %p1677_p0 }
  0x64   : > { %p1683_p7 = pnand %p1681_p5, %p1678_p2 }
  0x66   : > { %1686 = shalt.err (!%p1683_p7)
}
  0x67   : > { %s1687_s30 = scalar_lea.vmem %s445_s11, 512  ;;  %p1695_p11 = scmp.lt.s32.totalorder %s445_s11, %s445_s11 }
  0x68   : > { %p1688_p9 = scmp.ne.s32.totalorder %s445_s11, %s1687_s30  ;;  %p1696_p12 = scmp.lt.s32.totalorder %s1687_s30, %s1687_s30 }
  0x6a   : > { %p1690_p4 = pnand %p1688_p9, %p1952_p8  ;;  %p1697_p1 = por %p1696_p12, %p1695_p11 }
  0x6c   : > { %p1691_p10 = pneg %p1690_p4 }
  0x6e   : > { %p1698_p3 = pnand %p1697_p1, %p1691_p10 }
  0x70   : > { %1701 = shalt.err (!%p1698_p3)
}
  0x71   : > { %1522 = dma.hbm_to_vmem [thread:$0]  (!%p1936_p6), %s2291_s7, 512, %s445_s11, [#allocation9], %s1811_s15, %s1811_s15, %s1812_s13  }
  0x72   : > { %s1329_s28 = sadd.s32 4294967294, %s1806_s21   ;;  %s2051_s26 = sadd.s32 1, %s1806_s21  }
  0x73   : > { %s37_s10 = ssub.s32 %s1806_s21, %s2051_s26  ;;  %s40_s12 = sadd.s32 1, %s1802_s20 }
  0x74   : > { %p38_p1 = scmp.eq.s32.totalorder %s37_s10, 0  ;;  %p47_p3 = scmp.ne.s32.totalorder %s1802_s20, %s1798_s19 }
  0x75   : > { %p48_p8 = scmp.eq.s32.totalorder %s1806_s21, 0  ;;  %p53_p13 = scmp.ne.s32.totalorder %s1798_s19, %s1794_s18 }
  0x76   : > { %s2062_s16 = scalar_select %p38_p1, %s1802_s20, %s40_s12  }
  0x77   : > { %p2064_p0 = por %p48_p8, %p47_p3  ;;  %p2320_p2 = scmp.eq.s32.totalorder %s1920_s24, 0 }
  0x78   : > { %p371_p5 = scmp.eq.s32.totalorder %s1920_s24, 1  ;;  %p377_p7 = scmp.eq.s32.totalorder %s1329_s28, 1 }
  0x79   : > { %p2070_p6 = por %p2320_p2, %p53_p13  ;;  %p1535_p9 = scmp.lt.s32.totalorder %s1806_s21, 2 }
  0x7a   : > { %s479_s13 = sand.u32 1, %s1802_s20   ;;  %p2077_p4 = por %p371_p5, %p47_p3 }
  0x7b   : > { %p2081_p10 = por %p377_p7, %p53_p13  ;;  %s1336_s29 = sshll.u32 %s479_s13, 3 }
  0x7c   : > { %s2322_s11 = scalar_select %p2077_p4, 1, 0 }
  0x7d   : > { %s2323_s22 = scalar_select %p2081_p10, 1, 0 }
  0x7e   : > { %s1337_s14 = sshll.u32 %s1806_s21, 7  ;;  %s2324_s0 = sld [smem:[#allocation16_spill]] }
  0x7f   : > { %s483_s9 = scalar_lea.vmem [#allocation2], %s1336_s29  ;;  %p2095_p11 = pnand %p1535_p9, %p2064_p0 }
  0x80   : > { %s490_s28 = sshll.u32 %s483_s9, 4  ;;  %s480_s12 = scalar_lea.sflag [#allocation3], %s479_s13  ;;  %s2091_s28 = int_to_ptr.vmem [resolvable:$true] %s490_s28 }
  0x81   : > { %p1704_p1 = pneg %p2095_p11 }
  0x84   : > { %s2089_s23 = scalar_lea.hbm %s2324_s0, %s1337_s14  ;;  %s1707_s27 = scalar_lea.hbm %s2324_s0, 256 }
  0x85   : > { %s1702_s1 = scalar_lea.hbm %s2089_s23, 128  ;;  %p1708_p13 = scmp.lt.u32.totalorder %s2089_s23, %s2324_s0 }
  0x86   : > { %p1703_p12 = scmp.ne.s32.totalorder %s2089_s23, %s1702_s1  ;;  %p1709_p0 = scmp.lt.u32.totalorder %s1707_s27, %s1702_s1 }
  0x87   : > { %p1711_p5 = scmp.lt.u32.totalorder %s1702_s1, %s2089_s23 }
  0x88   : > { %p1705_p3 = pnand %p1704_p1, %p1703_p12  ;;  %p1710_p2 = por %p1709_p0, %p1708_p13 }
  0x8a   : > { %p1706_p8 = pneg %p1705_p3  ;;  %p1712_p7 = por %p1711_p5, %p1710_p2 }
  0x8c   : > { %p1713_p9 = pnand %p1712_p7, %p1706_p8 }
  0x8e   : > { %1716 = shalt.err (!%p1713_p9)
}
  0x8f   : > { %s1717_s13 = scalar_lea.vmem %s2091_s28, 128  ;;  %s1814_s9 = smov [#allocation2]  }
  0x90   : > { %p1718_p12 = scmp.ne.s32.totalorder %s2091_s28, %s1717_s13  ;;  %s1722_s29 = sshll.u32 %s1814_s9, 4  ;;  %s1723_s29 = int_to_ptr.vmem [resolvable:$false] %s1722_s29 }
  0x91   : > { %s1724_s14 = scalar_lea.vmem %s1723_s29, 256  ;;  %p1725_p4 = scmp.lt.s32.totalorder %s2091_s28, %s1723_s29 }
  0x92   : > { %p1720_p3 = pnand %p1718_p12, %p1704_p1  ;;  %p1726_p13 = scmp.lt.s32.totalorder %s1724_s14, %s1717_s13 }
  0x94   : > { %p1721_p10 = pneg %p1720_p3  ;;  %p1727_p0 = por %p1726_p13, %p1725_p4 }
  0x96   : > { %p1728_p2 = pnand %p1727_p0, %p1721_p10 }
  0x98   : > { %1731 = shalt.err (!%p1728_p2)
}
  0x99   : > { %1526 = dma.hbm_to_vmem [thread:$0]  (!%p2095_p11), %s2089_s23, 128, %s2091_s28, %s480_s12  }
  0x9a   : > { %p2326_p8 = scmp.ne.s32.totalorder %s2315_s25, 0 }
  0x9b   : > { %s2127_s1 = sand.u32 (!%p2326_p8), 1, %s1798_s19  }
  0x9c   : > { %499 = sbr.rel (%p2326_p8) target bundleno = 2207 (0x89f), region = 80  ;;  %s1339_s27 = sshll.u32 (!%p2326_p8), %s2127_s1, 3 }
  0x9d   : > { %s502_s17 = scalar_lea.sflag (!%p2326_p8), [#allocation3], %s2127_s1  ;;  %s2133_s30 = scalar_lea.vmem (!%p2326_p8), [#allocation2], %s1339_s27 }
  0xa3   : > { %1777 = dma.done.wait (%p2070_p6), %s502_s17, 128  }
  0xa4   : > { %1779 = vsyncadd (%p2070_p6), %s502_s17, 4294967168  ;;  %p2327_p4 = scmp.eq.s32.totalorder %s1920_s24, 0 }
  0xa6   : > { %1781 = dma.done.wait (%p2327_p4), [#allocation6], 1024   ;;  %p2328_p10 = pmov %p2327_p4 }
  0xa7   : > { %p2329_p11 = pmov %p2327_p4 }
  0xa8   : > { %1783 = vsyncadd (%p2328_p10), [#allocation6], 4294966272 }
  0xa9   : > { %1785 = dma.done.wait (%p2329_p11), [#allocation9], 1024   ;;  %p2330_p1 = pmov %p2327_p4 }
  0xaa   : > { %v1815_v0 = vmov 0.0|0.0   ;;  %vm1816_vm0 = vmmov 0   ;;  %v1817_v1 = vmov 0.0   ;;  %v662_v2 = vld [vmem:[#allocation7] sm:$0xff]  ;;  %v663_v3 = vld [vmem:[#allocation7 + $0x8] sm:$0xff]  ;;  %v664_v7 = vld [vmem:[#allocation7 + $0x10] sm:$0xff] }
  0xab   : > { %1787 = vsyncadd (%p2330_p1), [#allocation9], 4294966272  ;;  %1466 = vmatprep.subr.bf16.mxu1 %v1815_v0  ;;  %1460 = vmatprep.subr.bf16.mxu0 %v1815_v0  ;;  %v578_v4 = vld [vmem:[#allocation5] sm:$0xff]  ;;  %v1467_v5 = vpack.c.bf16 %v663_v3, %v662_v2  ;;  %v579_v6 = vld [vmem:[#allocation5 + $0x8] sm:$0xff]  ;;  %vm588_vm1 = vcmask 261120   ;;  %s2331_s2 = sld [smem:[#allocation18_spill]] }
  0xac   : > { %1414 = vmatprep.mubr.msk.f32.mxu1 %vm1816_vm0, %v1817_v1  ;;  %1403 = vmatprep.mubr.msk.f32.mxu0 %vm1816_vm0, %v1817_v1  ;;  %v665_v8 = vld [vmem:[#allocation7 + $0x18] sm:$0xff]  ;;  %v1461_v9 = vpack.c.bf16 %v579_v6, %v578_v4  ;;  %v580_v10 = vld [vmem:[#allocation5 + $0x10] sm:$0xff]  ;;  %v742_v23 = vld [vmem:[#allocation8] sm:$0xff]  ;;  %vm898_vm2 = vcmask 64512   ;;  %s2332_s17 = sld [smem:[#allocation21_spill]]  ;;  %s2333_s9 = sld [smem:[#allocation19_spill]] }
  0xad   : > { %v581_v11 = vld [vmem:[#allocation5 + $0x18] sm:$0xff]  ;;  %1468 = vmatpush3.bf16.msra.mxu1 %v1467_v5  ;;  %v1470_v12 = vpack.c.bf16 %v665_v8, %v664_v7  ;;  %v1347_v15 = vld [vmem:[%s2288_s4] ss:$0 sm:$0xff]  ;;  %v743_v24 = vld [vmem:[#allocation8 + $0x8] sm:$0xff]  ;;  %s2335_s23 = sld [smem:[#allocation22_spill]]  ;;  %s2336_s12 = sld [smem:[#allocation23_spill]] }
  0xae   : > { %1462 = vmatpush3.bf16.msra.mxu0 %v1461_v9  ;;  %1469 = vmatprep.subr.bf16.mxu1 %v1815_v0  ;;  %v1464_v13 = vpack.c.bf16 %v581_v11, %v580_v10  ;;  %v2156_v14 = vld [vmem:[%s2133_s30] sm:$0xff]  ;;  %v1473_v26 = vpack.c.bf16 %v743_v24, %v742_v23  ;;  %v983_v41 = vld [vmem:[#allocation10] sm:$0xff]  ;;  %v984_v42 = vld [vmem:[#allocation10 + $0x8] sm:$0xff]  ;;  %s2334_s30 = sld [smem:[#allocation20_spill]]  ;;  %s2337_s29 = sld [smem:[#allocation24_spill]] }
  0xaf   : > { %1463 = vmatprep.subr.bf16.mxu0 %v1815_v0  ;;  %v744_v25 = vld [vmem:[#allocation8 + $0x10] sm:$0xff]  ;;  %v745_v27 = vld [vmem:[#allocation8 + $0x18] sm:$0xff]  ;;  %v1479_v44 = vpack.c.bf16 %v984_v42, %v983_v41  ;;  %s1363_s14 = sshll.u32 %s1920_s24, 7  ;;  %s2338_s0 = sld [smem:[#allocation25_spill]] }
  0xb0   : > { %v1476_v28 = vpack.c.bf16 %v745_v27, %v744_v25  ;;  %v1349_v38 = vld [vmem:[%s2290_s6] ss:$0 sm:$0xff]  ;;  %v986_v45 = vld [vmem:[#allocation10 + $0x18] sm:$0xff]  ;;  %s1208_s28 = scalar_lea.sflag [#allocation4], %s2127_s1  ;;  %p2339_p5 = scmp.ne.s32.totalorder %s2322_s11, 0 }
  0xb1   : > { %1471 = vmatpush3.bf16.msra.mxu1 %v1470_v12  ;;  %v1345_v16 = vld [vmem:[%s2331_s2] ss:$0 sm:$0xff]  ;;  %s1818_s24 = smov [#allocation11]  }
  0xb2   : > { %1465 = vmatpush3.bf16.msra.mxu0 %v1464_v13  ;;  %1428 = vmatprep.subr.mxu1 %v1817_v1  ;;  %v985_v43 = vld [vmem:[#allocation10 + $0x10] sm:$0xff]  ;;  %v1097_v3 = vld [vmem:[%s2332_s17 + $0x10] sm:$0xff]  ;;  %v1098_v4 = vld [vmem:[%s2332_s17 + $0x18] sm:$0xff] }
  0xb3   : > { %1472 = vmatprep.subr.bf16.mxu0 %v1815_v0  ;;  %v1482_v46 = vpack.c.bf16 %v986_v45, %v985_v43  ;;  %v1354_v52 = vld [vmem:[%s2292_s8] ss:$0 sm:$0xff]  ;;  %v1488_v5 = vpack.c.bf16 %v1098_v4, %v1097_v3 }
  0xb4   : > { %1415 = vmatmul.mubr.msk.f32.vlgmr.msra.gmra.mrb[0].mxu1 %vm588_vm1, %v2156_v14  ;;  %v1095_v63 = vld [vmem:[%s2332_s17] sm:$0xff] }
  0xb5   : > { %1404 = vmatmul.mubr.msk.f32.vlgmr.msra.gmra.mrb[0].mxu0 %vm588_vm1, %v2156_v14  ;;  %1430 = vmatprep.mubr.msk.f32.mxu1 %vm1816_vm0, %v1817_v1  ;;  %v1356_v10 = vld [vmem:[%s2333_s9] ss:$0 sm:$0xff]  ;;  %s2239_s2 = scalar_lea.hbm %s2338_s0, %s1363_s14 }
  0xb6   : > { %1425 = vmatprep.mubr.msk.f32.mxu0 %vm1816_vm0, %v1817_v1  ;;  %1474 = vmatpush3.bf16.msra.mxu0 %v1473_v26  ;;  %v1357_v11 = vld [vmem:[%s2334_s30] ss:$0 sm:$0xff]  ;;  %s567_s30 = scalar_lea.vmem [#allocation11], %s1339_s27  ;;  %s1736_s27 = sshll.u32 %s1818_s24, 4  ;;  %s1737_s27 = int_to_ptr.vmem [resolvable:$false] %s1736_s27 }
  0xb7   : > { %1475 = vmatprep.subr.bf16.mxu0 %v1815_v0  ;;  %s1221_s25 = sshll.u32 %s567_s30, 4  ;;  %s2241_s25 = int_to_ptr.vmem [resolvable:$true] %s1221_s25 }
  0xb8   : > { %s1732_s10 = scalar_lea.vmem %s2241_s25, 128  ;;  %p1739_p12 = scmp.lt.s32.totalorder %s2241_s25, %s1737_s27 }
  0xb9   : > { %p1733_p6 = scmp.ne.s32.totalorder %s2241_s25, %s1732_s10 }
  0xba   : > { %1477 = vmatpush3.bf16.msra.mxu0 %v1476_v28 }
  0xbb   : > { %1478 = vmatprep.subr.bf16.mxu0 %v1815_v0  ;;  %p1734_p7 = pnand %p1733_p6, %p2339_p5 }
  0xbd   : > { %1426 = vmatmul.mubr.msk.f32.vlgmr.msra.gmra.mrb[2].mxu0 %vm588_vm1, %v2156_v14  ;;  %p1735_p9 = pneg %p1734_p7 }
  0xbe   : > { %1446 = vmatprep.mubr.msk.f32.mxu0 %vm1816_vm0, %v1817_v1  ;;  %1480 = vmatpush3.bf16.msra.mxu0 %v1479_v44 }
  0xbf   : > { %1481 = vmatprep.subr.bf16.mxu0 %v1815_v0 }
  0xc2   : > { %1483 = vmatpush3.bf16.msra.mxu0 %v1482_v46 }
 0x187   : > { %v738_v17 = vpop.f32.mrb[0].mxu1 }
 0x188   : > { %v739_v18 = vadd.f32 %v1347_v15, %v738_v17  ;;  %v1416_v19 = vpop.f32.mrb[1].mxu1  ;;  %v658_v20 = vpop.f32.mrb[0].mxu0 }
 0x189   : > { %v659_v21 = vadd.f32 %v1345_v16, %v658_v20  ;;  %v1405_v22 = vpop.f32.mrb[1].mxu0 }
 0x18a   : > { %1429 = vmatpush3.xpose.msk.msra.mxu1 %vm588_vm1, %v739_v18 }
 0x18b   : > { %1433 = vmatprep.subr.mxu1 %v1817_v1 }
 0x18d   : > { %1431 = vmatmul.mubr.msk.f32.vlgmr.msra.gmra.mrb[2].mxu1 %vm588_vm1, %v659_v21 }
 0x18e   : > { %1435 = vmatprep.mubr.msk.f32.mxu1 %vm1816_vm0, %v1817_v1 }
 0x190   : > { %v818_v37 = vpop.f32.mrb[2].mxu0 }
 0x191   : > { %v1427_v39 = vpop.f32.mrb[3].mxu0  ;;  %v819_v40 = vadd.f32 %v1349_v38, %v818_v37 }
 0x193   : > { %1434 = vmatpush3.msra.mxu1 %v819_v40 }
 0x194   : > { %1484 = vmatprep.subr.bf16.mxu1 %v1815_v0 }
 0x260   : > { %v894_v29 = vpop.f32.mrb[2].mxu1 }
 0x261   : > { %v1432_v30 = vpop.f32.mrb[3].mxu1  ;;  %v899_v31 = vsel %vm898_vm2, %v894_v29, -inf }
 0x262   : > { %900 = vmax.xlane.f32.xlu0 %v899_v31  ;;  %v1361_v31 = vld [vmem:[%s2337_s29] ss:$0 sm:$0xff] }
 0x2ef   : > { %v901_v32 = vpop.xlane.xlu0 %900 }
 0x2f0   : > { %v902_v33 = vsub.f32 %v894_v29, %v901_v32  ;;  %v1360_v29 = vld [vmem:[%s2336_s12] ss:$0 sm:$0xff]  ;;  %s1738_s12 = scalar_lea.vmem %s1737_s27, 256 }
 0x2f1   : > { %p1740_p3 = scmp.lt.s32.totalorder %s1738_s12, %s1732_s10 }
 0x2f2   : > { %v903_v34 = vmul.f32 1.442695, %v902_v33 }
 0x2f3   : > { %p1741_p13 = por %p1740_p3, %p1739_p12 }
 0x2f4   : > { %1582 = vpow2.f32 %v903_v34 }
 0x2f5   : > { %p1742_p0 = pnand %p1741_p13, %p1735_p9 }
 0x2fe   : > { %v1583_v35 = vpop.eup %1582 }
 0x2ff   : > { %v905_v36 = vsel %vm898_vm2, %v1583_v35, 0.0 }
 0x300   : > { %906 = vadd.xlane.f32.xlu0 %v905_v36 }
 0x38d   : > { %v907_v47 = vpop.xlane.xlu0 %906 }
 0x38e   : > { %1584 = vrcp.f32 %v907_v47 }
 0x398   : > { %v1585_v48 = vpop.eup %1584 }
 0x399   : > { %v909_v49 = vmul.f32 %v1585_v48, %v1583_v35 }
 0x39b   : > { %1436 = vmatmul.mubr.msk.f32.vlgmr.msra.gmra.mrb[4].mxu1 %vm898_vm2, %v909_v49 }
 0x39c   : > { %1457 = vmatprep.mubr.msk.f32.mxu1 %vm1816_vm0, %v1817_v1  ;;  %v1096_v1 = vld [vmem:[%s2332_s17 + $0x8] sm:$0xff] }
 0x39d   : > { %v1485_v2 = vpack.c.bf16 %v1096_v1, %v1095_v63 }
 0x39f   : > { %1486 = vmatpush3.bf16.msra.mxu1 %v1485_v2 }
 0x3a0   : > { %1487 = vmatprep.subr.bf16.mxu1 %v1815_v0 }
 0x3a3   : > { %1489 = vmatpush3.bf16.msra.mxu1 %v1488_v5 }
 0x46e   : > { %v979_v50 = vpop.f32.mrb[4].mxu1 }
 0x46f   : > { %v1437_v51 = vpop.f32.mrb[5].mxu1  ;;  %1447 = vmatmul.mubr.msk.f32.vlgmr.msra.gmra.mrb[4].mxu0 %vm588_vm1, %v979_v50 }
 0x542   : > { %v1062_v53 = vpop.f32.mrb[4].mxu0 }
 0x543   : > { %v1063_v54 = vadd.f32 %v1354_v52, %v1062_v53  ;;  %v1448_v55 = vpop.f32.mrb[5].mxu0 }
 0x545   : > { %v1066_v56 = vadd.f32 %v1063_v54, %v2156_v14  ;;  %v1358_v14 = vld [vmem:[%s2335_s23] ss:$0 sm:$0xff] }
 0x547   : > { %v1067_v57 = vsel %vm588_vm1, %v1066_v56, 0.0 }
 0x548   : > { %1068 = vadd.xlane.f32.xlu1 %v1067_v57 }
 0x5d5   : > { %v1069_v58 = vpop.xlane.xlu1 %1068 }
 0x5d6   : > { %v1071_v59 = vmul.f32 0.03125, %v1069_v58 }
 0x5d8   : > { %v1072_v60 = vsub.f32 %v1066_v56, %v1071_v59 }
 0x5da   : > { %v1073_v61 = vmul.f32 %v1072_v60, %v1072_v60 }
 0x5dc   : > { %v1074_v62 = vsel %vm588_vm1, %v1073_v61, 0.0 }
 0x5dd   : > { %1075 = vadd.xlane.f32.xlu1 %v1074_v62 }
 0x66a   : > { %v1076_v6 = vpop.xlane.xlu1 %1075 }
 0x66b   : > { %v1077_v7 = vmul.f32 0.03125, %v1076_v6 }
 0x66d   : > { %v1078_v8 = vadd.f32 1e-05, %v1077_v7 }
 0x66f   : > { %1586 = vrsqrt.f32 %v1078_v8 }
 0x679   : > { %v1587_v9 = vpop.eup %1586 }
 0x67a   : > { %v1080_v0 = vmul.f32 %v1587_v9, %v1072_v60 }
 0x67c   : > { %v1087_v12 = vmul.f32 %v1356_v10, %v1080_v0 }
 0x67e   : > { %v1094_v13 = vadd.f32 %v1357_v11, %v1087_v12 }
 0x680   : > { %1458 = vmatmul.mubr.msk.f32.vlgmr.msra.gmra.mrb[6].mxu1 %vm588_vm1, %v1094_v13 }
 0x753   : > { %v1174_v15 = vpop.f32.mrb[6].mxu1 }
 0x754   : > { %v1175_v16 = vadd.f32 %v1358_v14, %v1174_v15  ;;  %v1459_v17 = vpop.f32.mrb[7].mxu1 }
 0x756   : > { %v1178_v18 = vadd.f32 %v1175_v16, %v1094_v13 }
 0x758   : > { %v1179_v19 = vsel %vm588_vm1, %v1178_v18, 0.0 }
 0x759   : > { %1180 = vadd.xlane.f32.xlu0 %v1179_v19 }
 0x7e6   : > { %v1181_v20 = vpop.xlane.xlu0 %1180 }
 0x7e7   : > { %v1182_v21 = vmul.f32 0.03125, %v1181_v20 }
 0x7e9   : > { %v1183_v22 = vsub.f32 %v1178_v18, %v1182_v21 }
 0x7eb   : > { %v1184_v23 = vmul.f32 %v1183_v22, %v1183_v22 }
 0x7ed   : > { %v1185_v24 = vsel %vm588_vm1, %v1184_v23, 0.0 }
 0x7ee   : > { %1186 = vadd.xlane.f32.xlu1 %v1185_v24 }
 0x87b   : > { %v1187_v25 = vpop.xlane.xlu1 %1186 }
 0x87c   : > { %v1188_v26 = vmul.f32 0.03125, %v1187_v25 }
 0x87e   : > { %v1189_v27 = vadd.f32 1e-05, %v1188_v26 }
 0x880   : > { %1588 = vrsqrt.f32 %v1189_v27 }
 0x88a   : > { %v1589_v28 = vpop.eup %1588 }
 0x88b   : > { %v1191_v30 = vmul.f32 %v1589_v28, %v1183_v22 }
 0x88d   : > { %v1198_v32 = vmul.f32 %v1360_v29, %v1191_v30 }
 0x88f   : > { %v1205_v33 = vadd.f32 %v1361_v31, %v1198_v32 }
 0x891   : > { %1206 = vst.msk [vmem:[%s567_s30] sm:$0xff] %vm588_vm1, %v1205_v33 }
 0x892   : > { %1745 = shalt.err (!%p1742_p0)
}
 0x893   : > { %s1746_s1 = scalar_lea.hbm %s2239_s2, 128  ;;  %s1750_s29 = scalar_lea.hbm %s2338_s0, 256 }
 0x894   : > { %p1747_p2 = scmp.ne.s32.totalorder %s2239_s2, %s1746_s1  ;;  %p1751_p10 = scmp.lt.u32.totalorder %s2239_s2, %s2338_s0 }
 0x895   : > { %p1752_p11 = scmp.lt.u32.totalorder %s1750_s29, %s1746_s1  ;;  %p1754_p6 = scmp.lt.u32.totalorder %s1746_s1, %s2239_s2 }
 0x896   : > { %p1748_p8 = pnand %p1747_p2, %p2339_p5 }
 0x897   : > { %p1753_p1 = por %p1752_p11, %p1751_p10 }
 0x898   : > { %p1749_p4 = pneg %p1748_p8 }
 0x899   : > { %p1755_p7 = por %p1754_p6, %p1753_p1 }
 0x89b   : > { %p1756_p9 = pnand %p1755_p7, %p1749_p4 }
 0x89d   : > { %1759 = shalt.err (!%p1756_p9)
}
 0x89e   : > { %1508 = dma.vmem_to_hbm [thread:$0]  (%p2339_p5), %s2241_s25, 128, %s2239_s2, %s1208_s28  }
 0x89f PF: > { %s1233_s15 = sand.u32 1, %s1794_s18   ;;  %p2340_p12 = scmp.ne.s32.totalorder %s2323_s22, 0 }
 0x8a0   : > { %p2341_p3 = scmp.ge.s32.totalorder %s1806_s21, 2  ;;  %s1234_s23 = scalar_lea.sflag [#allocation4], %s1233_s15 }
 0x8a2   : > { %p1528_p13 = pnand %p2341_p3, %p2340_p12 }
 0x8a4   : > { %1789 = dma.done.wait (!%p1528_p13), %s1234_s23, 128  }
 0x8a5   : > { %1791 = vsyncadd (!%p1528_p13), %s1234_s23, 4294967168  ;;  %p30_p0 = scmp.ge.s32.totalorder %s2051_s26, 4   ;;  %s2342_s18 = smov %s1798_s19 }
 0x8a6   : > { %s2343_s19 = smov %s1802_s20  ;;  %s2344_s20 = smov %s2062_s16 }
 0x8a7   : > { %s2345_s21 = smov %s2051_s26  ;;  %32 = sbr.rel (!%p30_p0) target bundleno = 18 (0x12), region = 141 }
 0x8ae   :  { %1239 = vsyncpa [#allocation3], 1 }
 0x8af   :  { %1241 = vsyncpa [#allocation3 + $0x1], 1 }
 0x8b0   :  { %1242 = vsyncpa [#allocation6], 1 }
 0x8b1   :  { %1243 = vsyncpa [#allocation9], 1 }
 0x8b2   :  { %1244 = vsyncpa [#allocation4], 1 }
 0x8b3   :  { %1246 = vsyncpa [#allocation4 + $0x1], 1 }

</bundles_post_ra>
